<compile_context>
chip_gen: v7x
topology: tpu7x:2x2x1
jax: 0.10.0
libtpu: 0.0.40
codegen_flags: <defaults>
</compile_context>

<pallas_src>
import functools
import numpy as np
import jax
import jax.numpy as jnp
from jax import lax
from jax.experimental import pallas as pl
from jax.experimental.pallas import tpu as pltpu

INPUT_LEN = 4      # 2048 board is 4x4 (fc_layer expects 2*2*128 after the CNN)
OUTPUT_NUM = 4     # number of actions
BN_EPS = 1e-5


# ---------------------------------------------------------------------------
# Pallas kernel: full forward pass for one batch tile of boards.
# ---------------------------------------------------------------------------
def dueling_kernel(x_ref, A_ref, W2_ref, Wt_ref, sb1_ref, sb2_ref, bt_ref,
                   out_ref):
    # conv1 (3x3, pad 1, no bias) at the 4 surviving output pixels, fused
    # across pixels (lane = pixel*32 + channel): (tb, 128), f32 accumulation.
    h1 = jnp.dot(x_ref[...], A_ref[...], preferred_element_type=jnp.float32)
    # BN1 + ReLU, emit bf16 directly (no separate f32 copy / cast pass).
    h1 = jnp.maximum(h1 * sb1_ref[0:1, :] + sb1_ref[1:2, :],
                     0.0).astype(jnp.bfloat16)

    # conv2 (1x1, stride 2, no bias) as a block-diagonal matmul: (tb, 256)
    h2 = jnp.dot(h1, W2_ref[...], preferred_element_type=jnp.float32)
    h2 = jnp.maximum(h2 * sb2_ref[0:1, :] + sb2_ref[1:2, :],
                     0.0).astype(jnp.bfloat16)                 # BN2 + ReLU

    # Folded affine tail (conv3 + BN3 + fc1 + fc2 + value/advantage heads),
    # zero-padded to 128 output lanes for full-width stores:
    # col 0 = value, cols 1..4 = advantage, rest 0.
    out = jnp.dot(h2, Wt_ref[...], preferred_element_type=jnp.float32)
    out_ref[...] = (out + bt_ref[...]).astype(out_ref.dtype)


# ---------------------------------------------------------------------------
# Wrapper
# ---------------------------------------------------------------------------
def _round_up(v, m):
    return ((v + m - 1) // m) * m


@functools.partial(jax.jit, static_argnames=("tile_b",))
def dueling_forward(x, kargs, tile_b=512):
    # Board values are small integers in real use -> bf16 is exact for them.
    x2 = x.reshape(-1, INPUT_LEN * INPUT_LEN).astype(jnp.bfloat16)
    B = x2.shape[0]
    b16 = _round_up(B, 16)
    # Tiles are multiples of 16 rows (bf16 sublane packing); split the batch
    # into >=2 tiles when large enough so both v7x TensorCores get work.
    tb = min(max(16, (tile_b // 16) * 16), _round_up(max(b16 // 2, 8), 16))
    Bp = _round_up(B, tb)                          # padded batch
    if Bp != B:
        x2 = jnp.pad(x2, ((0, Bp - B), (0, 0)))

    head = pl.pallas_call(
        dueling_kernel,
        out_shape=jax.ShapeDtypeStruct((Bp, 128), jnp.bfloat16),
        grid=(Bp // tb,),
        in_specs=[
            pl.BlockSpec((tb, 16), lambda i: (i, 0)),      # x (batch-tiled)
            pl.BlockSpec((16, 128), lambda i: (0, 0)),     # A (conv1, resident)
            pl.BlockSpec((128, 256), lambda i: (0, 0)),    # W2 block-diag
            pl.BlockSpec((256, 128), lambda i: (0, 0)),    # folded affine tail
            pl.BlockSpec((2, 128), lambda i: (0, 0)),      # BN1 scale/bias
            pl.BlockSpec((2, 256), lambda i: (0, 0)),      # BN2 scale/bias
            pl.BlockSpec((1, 128), lambda i: (0, 0)),      # tail bias
        ],
        out_specs=pl.BlockSpec((tb, 128), lambda i: (i, 0)),
        compiler_params=pltpu.CompilerParams(
            dimension_semantics=("parallel",),
            vmem_limit_bytes=32 * 1024 * 1024),
    )(x2, *kargs)

    head = head[:B].astype(jnp.float32)
    val = head[:, 0:1]
    act = head[:, 1:1 + OUTPUT_NUM]
    # Dueling combine (batch-wide mean of the value stream, exactly as the
    # PyTorch module) done in the wrapper so the batch grid axis stays
    # purely parallel.
    return val + act - jnp.mean(val)


# ---------------------------------------------------------------------------
# Deterministic parameter initialization (PyTorch shapes).
# ---------------------------------------------------------------------------
def init_params(key):
    ks = jax.random.split(key, 23)
    n = lambda k, shape, scale: scale * jax.random.normal(k, shape, jnp.float32)
    p = {}
    p["W1"] = n(ks[0], (32, 1, 3, 3), 1.0 / 3.0)
    p["g1"], p["be1"] = 1.0 + n(ks[1], (32,), 0.1), n(ks[2], (32,), 0.1)
    p["m1"] = n(ks[3], (32,), 0.1)
    p["v1"] = jax.random.uniform(ks[4], (32,), jnp.float32, 0.5, 1.5)
    p["W2"] = n(ks[5], (64, 32, 1, 1), 1.0 / np.sqrt(32))
    p["g2"], p["be2"] = 1.0 + n(ks[6], (64,), 0.1), n(ks[7], (64,), 0.1)
    p["m2"] = n(ks[8], (64,), 0.1)
    p["v2"] = jax.random.uniform(ks[9], (64,), jnp.float32, 0.5, 1.5)
    p["W3"] = n(ks[10], (128, 64, 1, 1), 1.0 / np.sqrt(64))
    p["g3"], p["be3"] = 1.0 + n(ks[11], (128,), 0.1), n(ks[12], (128,), 0.1)
    p["m3"] = n(ks[13], (128,), 0.1)
    p["v3"] = jax.random.uniform(ks[14], (128,), jnp.float32, 0.5, 1.5)
    p["Wfc1"] = n(ks[15], (1024, 512), 1.0 / np.sqrt(512))
    p["bfc1"] = n(ks[16], (1024,), 0.01)
    p["Wfc2"] = n(ks[17], (512, 1024), 1.0 / np.sqrt(1024))
    p["bfc2"] = n(ks[18], (512,), 0.01)
    p["Wv"] = n(ks[19], (1, 512), 1.0 / np.sqrt(512))
    p["bv"] = n(ks[20], (1,), 0.01)
    p["Wa"] = n(ks[21], (OUTPUT_NUM, 512), 1.0 / np.sqrt(512))
    p["ba"] = n(ks[22], (OUTPUT_NUM,), 0.01)
    return p


def build_kernel_args(p):
    """Glue: lower convs/BN/flatten order/fc/heads into fused matmul operands.

    The fold is done in float64 and only rounded to bf16 once at the end.
    """
    f64 = lambda a: np.asarray(a, np.float64)

    # conv1 output is only needed at the 4 pixels picked by the stride-2 conv2
    # (input positions (0,0),(0,2),(2,0),(2,2) -> 2x2 map pixels 0..3).
    W1 = f64(p["W1"])                                # (32, 1, 3, 3)
    sel = [(0, 0), (0, 2), (2, 0), (2, 2)]
    A = np.zeros((16, 4 * 32), np.float64)           # column = pixel*32 + channel
    for pi, (h, w) in enumerate(sel):
        for kh in range(3):
            for kw in range(3):
                ih, iw = h - 1 + kh, w - 1 + kw
                if 0 <= ih < 4 and 0 <= iw < 4:      # zero padding elsewhere
                    A[ih * 4 + iw, pi * 32:(pi + 1) * 32] += W1[:, 0, kh, kw]

    def bn_fold(g, b, m, v):
        g, b, m, v = map(f64, (g, b, m, v))
        s = g / np.sqrt(v + BN_EPS)
        return s, b - m * s

    s1, b1 = bn_fold(p["g1"], p["be1"], p["m1"], p["v1"])      # (32,)
    s2, b2 = bn_fold(p["g2"], p["be2"], p["m2"], p["v2"])      # (64,)
    s3, b3 = bn_fold(p["g3"], p["be3"], p["m3"], p["v3"])      # (128,)

    W2m = f64(p["W2"])[:, :, 0, 0].T                           # (32, 64)
    W3m = f64(p["W3"])[:, :, 0, 0].T                           # (64, 128)
    # Block-diagonal over the 4 pixels (pixel-major lane layout preserved).
    W2bd = np.zeros((128, 256), np.float64)
    W3bd = np.zeros((256, 512), np.float64)
    for pi in range(4):
        W2bd[pi * 32:(pi + 1) * 32, pi * 64:(pi + 1) * 64] = W2m
        W3bd[pi * 64:(pi + 1) * 64, pi * 128:(pi + 1) * 128] = W3m

    # BN3 tiled over the 4 pixels (lane = pixel*128 + channel).
    s3t, b3t = np.tile(s3, 4), np.tile(b3, 4)                  # (512,)

    # fc1 weight (512, 1024), rows permuted so that row index = pixel*128 + c
    # matches PyTorch's NCHW flatten index c*4 + pixel.
    perm = np.array([c * 4 + pi for pi in range(4) for c in range(128)])
    Wf1p = f64(p["Wfc1"]).T[perm, :]                           # (512, 1024)
    Wf2 = f64(p["Wfc2"]).T                                     # (1024, 512)

    # Fused value/advantage head, zero-padded to 128 output lanes.
    Wh = np.zeros((512, 128), np.float64)
    Wh[:, 0:1] = f64(p["Wv"]).T
    Wh[:, 1:1 + OUTPUT_NUM] = f64(p["Wa"]).T
    bh = np.zeros((128,), np.float64)
    bh[0] = f64(p["bv"])[0]
    bh[1:1 + OUTPUT_NUM] = f64(p["ba"])

    # Affine-tail fold: conv3 -> BN3 -> fc1 -> fc2 -> heads (no nonlinearity
    # anywhere in that chain in the PyTorch module).
    Wtail = (W3bd * s3t[None, :]) @ Wf1p @ Wf2 @ Wh            # (256, 128)
    btail = ((b3t @ Wf1p + f64(p["bfc1"])) @ Wf2 + f64(p["bfc2"])) @ Wh + bh

    # BN1/BN2 scale/bias tiled over the 4 pixels, packed as small lane-dense
    # f32 blocks (no padded (1, N) mega-row).
    sb1 = np.stack([np.tile(s1, 4), np.tile(b1, 4)])           # (2, 128)
    sb2 = np.stack([np.tile(s2, 4), np.tile(b2, 4)])           # (2, 256)

    bf16 = lambda a: jnp.asarray(a, jnp.bfloat16)
    return (
        bf16(A),                                   # (16, 128)
        bf16(W2bd),                                # (128, 256)
        bf16(Wtail),                               # (256, 128)
        jnp.asarray(sb1, jnp.float32),             # (2, 128)
        jnp.asarray(sb2, jnp.float32),             # (2, 256)
        jnp.asarray(btail[None, :], jnp.float32),  # (1, 128)
    )


# ---------------------------------------------------------------------------
# Pure-JAX reference (mirrors the PyTorch forward, BN in eval mode).
# ---------------------------------------------------------------------------
def ref_forward(x, p):
    xb = x.reshape(-1, 1, INPUT_LEN, INPUT_LEN).astype(jnp.float32)
    dn = ("NCHW", "OIHW", "NCHW")

    def bn(y, g, b, m, v):
        g, b, m, v = (a[None, :, None, None] for a in (g, b, m, v))
        return (y - m) / jnp.sqrt(v + BN_EPS) * g + b

    y = lax.conv_general_dilated(xb, p["W1"], (1, 1), [(1, 1), (1, 1)],
                                 dimension_numbers=dn)
    y = jax.nn.relu(bn(y, p["g1"], p["be1"], p["m1"], p["v1"]))
    y = lax.conv_general_dilated(y, p["W2"], (2, 2), "VALID", dimension_numbers=dn)
    y = jax.nn.relu(bn(y, p["g2"], p["be2"], p["m2"], p["v2"]))
    y = lax.conv_general_dilated(y, p["W3"], (1, 1), "VALID", dimension_numbers=dn)
    y = bn(y, p["g3"], p["be3"], p["m3"], p["v3"])
    f = y.reshape(y.shape[0], -1)                              # NCHW flatten: c*4 + p
    f = f @ p["Wfc1"].T + p["bfc1"]
    f = f @ p["Wfc2"].T + p["bfc2"]
    val = f @ p["Wv"].T + p["bv"]
    act = f @ p["Wa"].T + p["ba"]
    return val + act - jnp.mean(val)


if __name__ == "__main__":
    key = jax.random.PRNGKey(0)
    kx, kx2, kp = jax.random.split(key, 3)
    params = init_params(kp)
    kargs = build_kernel_args(params)

    # Small batch (single padded 16-row tile).
    x = jax.random.uniform(kx, (2, 16), jnp.float32)           # 2 boards, 4x4 flattened
    out = jax.block_until_ready(dueling_forward(x, kargs))
    ref = jax.block_until_ready(ref_forward(x, params))
    assert out.shape == (2, OUTPUT_NUM), out.shape
    np.testing.assert_allclose(np.asarray(out), np.asarray(ref), rtol=2e-2, atol=5e-2)

    # Larger batch exercising a multi-step parallel grid with resident weights.
    xb = jax.random.uniform(kx2, (192, 16), jnp.float32)
    outb = jax.block_until_ready(dueling_forward(xb, kargs, tile_b=64))
    refb = jax.block_until_ready(ref_forward(xb, params))
    assert outb.shape == (192, OUTPUT_NUM), outb.shape
    np.testing.assert_allclose(np.asarray(outb), np.asarray(refb), rtol=2e-2, atol=5e-2)

    # Default (large) tile path.
    outd = jax.block_until_ready(dueling_forward(xb, kargs))
    np.testing.assert_allclose(np.asarray(outd), np.asarray(refb), rtol=2e-2, atol=5e-2)

    print("KERNEL_OK")
</pallas_src>

<mosaic_0001>
module attributes {stable_mosaic.version = 11 : i64} {
  func.func @dueling_kernel(%arg0: i32, %arg1: memref<16x16xbf16, #tpu.memory_space<vmem>>, %arg2: memref<16x128xbf16, #tpu.memory_space<vmem>>, %arg3: memref<128x256xbf16, #tpu.memory_space<vmem>>, %arg4: memref<256x128xbf16, #tpu.memory_space<vmem>>, %arg5: memref<2x128xf32, #tpu.memory_space<vmem>>, %arg6: memref<2x256xf32, #tpu.memory_space<vmem>>, %arg7: memref<1x128xf32, #tpu.memory_space<vmem>>, %arg8: memref<16x128xbf16, #tpu.memory_space<vmem>>) attributes {dimension_semantics = [#tpu.dimension_semantics<parallel>], iteration_bounds = array<i64: 1>, scalar_prefetch = 0 : i64, scratch_operands = 0 : i64, tpu.core_type = #tpu.core_type<tc>, window_params = [{transform_indices = @transform_0, window_bounds = array<i64: 16, 16>}, {pipeline_mode = #tpu.pipeline_mode<synchronous>, transform_indices = @transform_1, window_bounds = array<i64: 16, 128>}, {pipeline_mode = #tpu.pipeline_mode<synchronous>, transform_indices = @transform_2, window_bounds = array<i64: 128, 256>}, {pipeline_mode = #tpu.pipeline_mode<synchronous>, transform_indices = @transform_3, window_bounds = array<i64: 256, 128>}, {pipeline_mode = #tpu.pipeline_mode<synchronous>, transform_indices = @transform_4, window_bounds = array<i64: 2, 128>}, {pipeline_mode = #tpu.pipeline_mode<synchronous>, transform_indices = @transform_5, window_bounds = array<i64: 2, 256>}, {pipeline_mode = #tpu.pipeline_mode<synchronous>, transform_indices = @transform_6, window_bounds = array<i64: 1, 128>}, {transform_indices = @transform_7, window_bounds = array<i64: 16, 128>}]} {
    %c0 = arith.constant 0 : index
    %c0_0 = arith.constant 0 : index
    %0 = vector.load %arg1[%c0, %c0_0] : memref<16x16xbf16, #tpu.memory_space<vmem>>, vector<16x16xbf16>
    %c0_1 = arith.constant 0 : index
    %c0_2 = arith.constant 0 : index
    %1 = vector.load %arg2[%c0_1, %c0_2] : memref<16x128xbf16, #tpu.memory_space<vmem>>, vector<16x128xbf16>
    %cst = arith.constant dense<0.000000e+00> : vector<16x128xf32>
    %2 = tpu.matmul %0, %1, %cst {dimension_numbers = #tpu.dot_dimension_numbers<[1], [0], [0], [1], [0, 0, 1, 1], [], []>} : vector<16x16xbf16>, vector<16x128xbf16>, vector<16x128xf32> -> vector<16x128xf32>
    %c0_3 = arith.constant 0 : index
    %c0_4 = arith.constant 0 : index
    %3 = vector.load %arg5[%c0_3, %c0_4] : memref<2x128xf32, #tpu.memory_space<vmem>>, vector<1x128xf32>
    %4 = vector.broadcast %3 : vector<1x128xf32> to vector<16x128xf32>
    %5 = arith.mulf %2, %4 : vector<16x128xf32>
    %c1 = arith.constant 1 : index
    %c0_5 = arith.constant 0 : index
    %6 = vector.load %arg5[%c1, %c0_5] : memref<2x128xf32, #tpu.memory_space<vmem>>, vector<1x128xf32>
    %7 = vector.broadcast %6 : vector<1x128xf32> to vector<16x128xf32>
    %8 = arith.addf %5, %7 : vector<16x128xf32>
    %cst_6 = arith.constant 0.000000e+00 : f32
    %9 = vector.broadcast %cst_6 : f32 to vector<16x128xf32>
    %10 = arith.maximumf %8, %9 : vector<16x128xf32>
    %11 = arith.truncf %10 : vector<16x128xf32> to vector<16x128xbf16>
    %c0_7 = arith.constant 0 : index
    %c0_8 = arith.constant 0 : index
    %12 = vector.load %arg3[%c0_7, %c0_8] : memref<128x256xbf16, #tpu.memory_space<vmem>>, vector<128x256xbf16>
    %cst_9 = arith.constant dense<0.000000e+00> : vector<16x256xf32>
    %13 = tpu.matmul %11, %12, %cst_9 {dimension_numbers = #tpu.dot_dimension_numbers<[1], [0], [0], [1], [0, 0, 1, 1], [], []>} : vector<16x128xbf16>, vector<128x256xbf16>, vector<16x256xf32> -> vector<16x256xf32>
    %c0_10 = arith.constant 0 : index
    %c0_11 = arith.constant 0 : index
    %14 = vector.load %arg6[%c0_10, %c0_11] : memref<2x256xf32, #tpu.memory_space<vmem>>, vector<1x256xf32>
    %15 = vector.broadcast %14 : vector<1x256xf32> to vector<16x256xf32>
    %16 = arith.mulf %13, %15 : vector<16x256xf32>
    %c1_12 = arith.constant 1 : index
    %c0_13 = arith.constant 0 : index
    %17 = vector.load %arg6[%c1_12, %c0_13] : memref<2x256xf32, #tpu.memory_space<vmem>>, vector<1x256xf32>
    %18 = vector.broadcast %17 : vector<1x256xf32> to vector<16x256xf32>
    %19 = arith.addf %16, %18 : vector<16x256xf32>
    %cst_14 = arith.constant 0.000000e+00 : f32
    %20 = vector.broadcast %cst_14 : f32 to vector<16x256xf32>
    %21 = arith.maximumf %19, %20 : vector<16x256xf32>
    %22 = arith.truncf %21 : vector<16x256xf32> to vector<16x256xbf16>
    %c0_15 = arith.constant 0 : index
    %c0_16 = arith.constant 0 : index
    %23 = vector.load %arg4[%c0_15, %c0_16] : memref<256x128xbf16, #tpu.memory_space<vmem>>, vector<256x128xbf16>
    %cst_17 = arith.constant dense<0.000000e+00> : vector<16x128xf32>
    %24 = tpu.matmul %22, %23, %cst_17 {dimension_numbers = #tpu.dot_dimension_numbers<[1], [0], [0], [1], [0, 0, 1, 1], [], []>} : vector<16x256xbf16>, vector<256x128xbf16>, vector<16x128xf32> -> vector<16x128xf32>
    %c0_18 = arith.constant 0 : index
    %c0_19 = arith.constant 0 : index
    %25 = vector.load %arg7[%c0_18, %c0_19] : memref<1x128xf32, #tpu.memory_space<vmem>>, vector<1x128xf32>
    %26 = vector.broadcast %25 : vector<1x128xf32> to vector<16x128xf32>
    %27 = arith.addf %24, %26 : vector<16x128xf32>
    %28 = arith.truncf %27 : vector<16x128xf32> to vector<16x128xbf16>
    %c0_20 = arith.constant 0 : index
    %c0_21 = arith.constant 0 : index
    %29 = vector.load %arg8[%c0_20, %c0_21] : memref<16x128xbf16, #tpu.memory_space<vmem>>, vector<16x128xbf16>
    tpu.vector_store %arg8[%c0_20, %c0_21], %28 {strides = array<i32>} : memref<16x128xbf16, #tpu.memory_space<vmem>>, vector<16x128xbf16>,
    return
  }
  func.func @transform_0(%arg0: i32) -> (i32, i32) {
    %c0_i32 = arith.constant 0 : i32
    %c0_i32_0 = arith.constant 0 : i32
    return %arg0, %c0_i32 : i32, i32
  }
  func.func @transform_1(%arg0: i32) -> (i32, i32) {
    %c0_i32 = arith.constant 0 : i32
    %c0_i32_0 = arith.constant 0 : i32
    %c0_i32_1 = arith.constant 0 : i32
    return %c0_i32, %c0_i32_0 : i32, i32
  }
  func.func @transform_2(%arg0: i32) -> (i32, i32) {
    %c0_i32 = arith.constant 0 : i32
    %c0_i32_0 = arith.constant 0 : i32
    %c0_i32_1 = arith.constant 0 : i32
    return %c0_i32, %c0_i32_0 : i32, i32
  }
  func.func @transform_3(%arg0: i32) -> (i32, i32) {
    %c0_i32 = arith.constant 0 : i32
    %c0_i32_0 = arith.constant 0 : i32
    %c0_i32_1 = arith.constant 0 : i32
    return %c0_i32, %c0_i32_0 : i32, i32
  }
  func.func @transform_4(%arg0: i32) -> (i32, i32) {
    %c0_i32 = arith.constant 0 : i32
    %c0_i32_0 = arith.constant 0 : i32
    %c0_i32_1 = arith.constant 0 : i32
    return %c0_i32, %c0_i32_0 : i32, i32
  }
  func.func @transform_5(%arg0: i32) -> (i32, i32) {
    %c0_i32 = arith.constant 0 : i32
    %c0_i32_0 = arith.constant 0 : i32
    %c0_i32_1 = arith.constant 0 : i32
    return %c0_i32, %c0_i32_0 : i32, i32
  }
  func.func @transform_6(%arg0: i32) -> (i32, i32) {
    %c0_i32 = arith.constant 0 : i32
    %c0_i32_0 = arith.constant 0 : i32
    %c0_i32_1 = arith.constant 0 : i32
    return %c0_i32, %c0_i32_0 : i32, i32
  }
  func.func @transform_7(%arg0: i32) -> (i32, i32) {
    %c0_i32 = arith.constant 0 : i32
    %c0_i32_0 = arith.constant 0 : i32
    return %arg0, %c0_i32 : i32, i32
  }
}

</mosaic_0001>

<bundles_post_ra>
// kernel: dueling_forward.1
= control target key start
LH: loop header
LB: loop body
LE: loop exit
PB: predicated region body
PF: predicated region fallthrough
CT: control target
= control target key end

     0   :  { %12 = vsyncpa [#allocation3], 0  ;;  %s776_s0 = inlined_call_operand.vmem [shape: bf16[16,16], index: 0, kind: input, shape index: {}]   ;;  %s777_s1 = inlined_call_operand.vmem [shape: bf16[16,128], index: 1, kind: input, shape index: {}]   ;;  %s778_s2 = inlined_call_operand.hbm [shape: bf16[128,256], index: 2, kind: input, shape index: {}]   ;;  %s779_s3 = inlined_call_operand.hbm [shape: bf16[256,128], index: 3, kind: input, shape index: {}]   ;;  %s780_s4 = inlined_call_operand.vmem [shape: f32[2,128], index: 4, kind: input, shape index: {}]   ;;  %s781_s5 = inlined_call_operand.vmem [shape: f32[2,256], index: 5, kind: input, shape index: {}]   ;;  %s782_s6 = inlined_call_operand.vmem [shape: f32[1,128], index: 6, kind: input, shape index: {}]   ;;  %s783_s7 = inlined_call_operand.vmem [shape: bf16[16,128], index: 7, kind: output, shape index: {}]  }
   0x1   :  { %13 = vsyncpa [#allocation5], 0  ;;  %s679_s24 = smov [#allocation2]   ;;  %s631_s28 = scalar_lea.hbm %s778_s2, 2048 }
   0x2   :  { %s23_s25 = sshll.u32 %s679_s24, 4  ;;  %p632_p0 = scmp.ne.s32.totalorder %s778_s2, %s631_s28  ;;  %s24_s25 = int_to_ptr.vmem [resolvable:$true] %s23_s25 }
   0x3   :  { %p635_p1 = scmp.lt.u32.totalorder %s631_s28, %s778_s2 }
   0x5   :  { %p637_p2 = pnand %p635_p1, %p632_p0 }
   0x7   :  { %640 = shalt.err (!%p637_p2)
}
   0x8   :  { %s641_s10 = scalar_lea.vmem %s24_s25, 2048  ;;  %p646_p4 = scmp.lt.s32.totalorder %s24_s25, %s24_s25 }
   0x9   :  { %p642_p3 = scmp.ne.s32.totalorder %s24_s25, %s641_s10  ;;  %p647_p5 = scmp.lt.s32.totalorder %s641_s10, %s641_s10 }
   0xb   :  { %p648_p6 = por %p647_p5, %p646_p4 }
   0xd   :  { %p649_p7 = pnand %p648_p6, %p642_p3 }
   0xf   :  { %652 = shalt.err (!%p649_p7)
}
  0x10   :  { %s680_s11 = smov 128   ;;  %s681_s12 = smov 8  }
  0x11   :  { %29 = dma.hbm_to_vmem [thread:$0]  %s778_s2, 2048, %s24_s25, [#allocation3], %s680_s11, %s680_s11, %s681_s12  }
  0x12   :  { %s682_s15 = smov [#allocation4]   ;;  %s653_s19 = scalar_lea.hbm %s779_s3, 2048 }
  0x13   :  { %s35_s16 = sshll.u32 %s682_s15, 4  ;;  %p654_p8 = scmp.ne.s32.totalorder %s779_s3, %s653_s19  ;;  %s36_s16 = int_to_ptr.vmem [resolvable:$true] %s35_s16 }
  0x14   :  { %p657_p9 = scmp.lt.u32.totalorder %s653_s19, %s779_s3 }
  0x16   :  { %p659_p10 = pnand %p657_p9, %p654_p8 }
  0x18   :  { %662 = shalt.err (!%p659_p10)
}
  0x19   :  { %s663_s24 = scalar_lea.vmem %s36_s16, 2048  ;;  %p668_p12 = scmp.lt.s32.totalorder %s36_s16, %s36_s16 }
  0x1a   :  { %p664_p11 = scmp.ne.s32.totalorder %s36_s16, %s663_s24  ;;  %p669_p13 = scmp.lt.s32.totalorder %s663_s24, %s663_s24 }
  0x1c   :  { %p670_p0 = por %p669_p13, %p668_p12 }
  0x1e   :  { %p671_p1 = pnand %p670_p0, %p664_p11 }
  0x20   :  { %674 = shalt.err (!%p671_p1)
}
  0x21   :  { %s683_s2 = smov 64   ;;  %s684_s25 = smov 4  }
  0x22   :  { %41 = dma.hbm_to_vmem [thread:$0]  %s779_s3, 2048, %s36_s16, [#allocation5], %s683_s2, %s683_s2, %s684_s25  }
  0x23   :  { %675 = dma.done.wait [#allocation3], 2048  }
  0x24   :  { %676 = vsyncadd [#allocation3], 4294965248 }
  0x25   :  { %677 = dma.done.wait [#allocation5], 2048  }
  0x26   :  { %678 = vsyncadd [#allocation5], 4294965248  ;;  %v685_v0 = vmov 0.0   ;;  %vm686_vm0 = vmmov 0   ;;  %v589_v1 = vld [vmem:[%s777_s1] sm:$0xff]   ;;  %vm70_vm1 = vcmask 130048   ;;  %v273_v49 = vlaneseq }
  0x27   :  { %574 = vmatprep.subr.bf16.mxu0 %v685_v0  ;;  %576 = vmatprep.mubr.msk.bf16.mxu0 %vm686_vm0, %v685_v0  ;;  %v590_v2 = vld [vmem:[%s776_s0] sm:$0xff]   ;;  %v594_v5 = vld [vmem:[#allocation2 + $0x14] ss:$8 sps:$4 sm:$0xff]   ;;  %v596_v6 = vld [vmem:[#allocation2 + $0x10] ss:$8 sps:$4 sm:$0xff]   ;;  %v687_v19 = vmov 0  }
  0x28   :  { %575 = vmatpush3.bf16.msra.mxu0 %v589_v1  ;;  %v591_v3 = vld [vmem:[#allocation2 + $0x4] ss:$8 sps:$4 sm:$0xff]   ;;  %v593_v4 = vld [vmem:[#allocation2] ss:$8 sps:$4 sm:$0xff]   ;;  %v600_v9 = vld [vmem:[#allocation2 + $0x34] ss:$8 sps:$4 sm:$0xff]   ;;  %260 = vmatprep.mubr.bf16.mxu1 %v687_v19 }
  0x29   :  { %228 = vmatprep.subr.bf16.mxu1 %v591_v3  ;;  %v597_v7 = vld [vmem:[#allocation2 + $0x24] ss:$8 sps:$4 sm:$0xff]   ;;  %v599_v8 = vld [vmem:[#allocation2 + $0x20] ss:$8 sps:$4 sm:$0xff]   ;;  %v602_v10 = vld [vmem:[#allocation2 + $0x30] ss:$8 sps:$4 sm:$0xff]  }
  0x2a   :  { %229 = vmatpush1.bf16.msra.mxu1 %v593_v4  ;;  %v603_v11 = vld [vmem:[#allocation2 + $0x44] ss:$8 sps:$4 sm:$0xff]   ;;  %v605_v12 = vld [vmem:[#allocation2 + $0x40] ss:$8 sps:$4 sm:$0xff]   ;;  %v606_v13 = vld [vmem:[#allocation2 + $0x54] ss:$8 sps:$4 sm:$0xff]  }
  0x2b   :  { %577 = vmatmul.mubr.msk.bf16.vlgmr.msra.gmra.mrb[0].mxu0 %vm70_vm1, %v590_v2  ;;  %230 = vmatprep.subr.bf16.mxu1 %v594_v5  ;;  %v608_v14 = vld [vmem:[#allocation2 + $0x50] ss:$8 sps:$4 sm:$0xff]   ;;  %v609_v15 = vld [vmem:[#allocation2 + $0x64] ss:$8 sps:$4 sm:$0xff]   ;;  %v611_v16 = vld [vmem:[#allocation2 + $0x60] ss:$8 sps:$4 sm:$0xff]  }
  0x2c   :  { %v612_v17 = vld [vmem:[#allocation2 + $0x74] ss:$8 sps:$4 sm:$0xff]   ;;  %v614_v18 = vld [vmem:[#allocation2 + $0x70] ss:$8 sps:$4 sm:$0xff]   ;;  %v615_v20 = vld [vmem:[#allocation4 + $0x40] sm:$0xff]   ;;  %v274_v50 = vshrl.u32 %v273_v49, 7 }
  0x2d   :  { %v616_v21 = vld [vmem:[#allocation4] sm:$0xff]   ;;  %v617_v22 = vld [vmem:[#allocation4 + $0x48] sm:$0xff]   ;;  %552 = vmatprep.subr.bf16.mxu0 %v615_v20  ;;  %v619_v24 = vld [vmem:[#allocation4 + $0x50] sm:$0xff]  }
  0x2e   :  { %231 = vmatpush1.bf16.msra.mxu1 %v596_v6  ;;  %553 = vmatpush3.bf16.msra.mxu0 %v616_v21  ;;  %v618_v23 = vld [vmem:[#allocation4 + $0x8] sm:$0xff]   ;;  %v620_v25 = vld [vmem:[#allocation4 + $0x10] sm:$0xff]   ;;  %v621_v26 = vld [vmem:[#allocation4 + $0x58] sm:$0xff]   ;;  %v275_v51 = vsub.s32 0, %v274_v50  ;;  %v279_v53 = vsub.s32 1, %v274_v50 }
  0x2f   :  { %232 = vmatprep.subr.bf16.mxu1 %v597_v7  ;;  %554 = vmatprep.subr.bf16.mxu0 %v617_v22  ;;  %v622_v27 = vld [vmem:[#allocation4 + $0x18] sm:$0xff]   ;;  %v623_v28 = vld [vmem:[#allocation4 + $0x60] sm:$0xff]   ;;  %v625_v43 = vld [vmem:[#allocation4 + $0x68] sm:$0xff]  }
  0x30   :  { %v624_v29 = vld [vmem:[#allocation4 + $0x20] sm:$0xff]   ;;  %v626_v44 = vld [vmem:[#allocation4 + $0x28] sm:$0xff]   ;;  %v627_v45 = vld [vmem:[#allocation4 + $0x70] sm:$0xff]  }
  0x31   :  { %v505_v30 = vld [vmem:[%s780_s4] ss:$0 sm:$0xff]  ;;  %v506_v32 = vld [vmem:[%s780_s4 + $0x1] ss:$0 sm:$0xff]  ;;  %v628_v46 = vld [vmem:[#allocation4 + $0x30] sm:$0xff]  }
  0x32   :  { %233 = vmatpush1.bf16.msra.mxu1 %v599_v8  ;;  %555 = vmatpush3.bf16.msra.mxu0 %v618_v23  ;;  %v629_v47 = vld [vmem:[#allocation4 + $0x78] sm:$0xff]   ;;  %v271_v52 = vld [vmem:[%s781_s5] ss:$2 sm:$0x3] }
  0x33   :  { %234 = vmatprep.subr.bf16.mxu1 %v600_v9  ;;  %556 = vmatprep.subr.bf16.mxu0 %v619_v24  ;;  %v630_v48 = vld [vmem:[#allocation4 + $0x38] sm:$0xff]   ;;  %v523_v54 = vld [vmem:[%s781_s5 + $0x1] ss:$2 sm:$0x3]  ;;  %v276_v55 = vrot.slane %v271_v52, %v275_v51  ;;  %v280_v56 = vrot.slane %v271_v52, %v279_v53 }
  0x34   :  { %v293_v57 = vrot.slane %v523_v54, %v275_v51  ;;  %v297_v59 = vrot.slane %v523_v54, %v279_v53 }
  0x36   :  { %235 = vmatpush1.bf16.msra.mxu1 %v602_v10  ;;  %557 = vmatpush3.bf16.msra.mxu0 %v620_v25 }
  0x37   :  { %236 = vmatprep.subr.bf16.mxu1 %v603_v11  ;;  %558 = vmatprep.subr.bf16.mxu0 %v621_v26 }
  0x3a   :  { %237 = vmatpush1.bf16.msra.mxu1 %v605_v12  ;;  %559 = vmatpush3.bf16.msra.mxu0 %v622_v27 }
  0x3b   :  { %238 = vmatprep.subr.bf16.mxu1 %v606_v13  ;;  %560 = vmatprep.subr.bf16.mxu0 %v623_v28 }
  0x3e   :  { %239 = vmatpush1.bf16.msra.mxu1 %v608_v14  ;;  %561 = vmatpush3.bf16.msra.mxu0 %v624_v29 }
  0x3f   :  { %240 = vmatprep.subr.bf16.mxu1 %v609_v15  ;;  %562 = vmatprep.subr.bf16.mxu0 %v625_v43 }
  0x42   :  { %241 = vmatpush1.bf16.msra.mxu1 %v611_v16  ;;  %563 = vmatpush3.bf16.msra.mxu0 %v626_v44 }
  0x43   :  { %242 = vmatprep.subr.bf16.mxu1 %v612_v17  ;;  %564 = vmatprep.subr.bf16.mxu0 %v627_v45  ;;  %v524_v17 = vld [vmem:[%s782_s6] ss:$0 sm:$0xff] }
  0x46   :  { %243 = vmatpush1.bf16.msra.mxu1 %v614_v18  ;;  %565 = vmatpush3.bf16.msra.mxu0 %v628_v46 }
  0x47   :  { %566 = vmatprep.subr.bf16.mxu0 %v629_v47 }
  0x4a   :  { %567 = vmatpush3.bf16.msra.mxu0 %v630_v48 }
  0xfe   :  { %v108_v31 = vpop.f32.mrb[0].mxu0 }
  0xff   :  { %v120_v33 = vmul.f32 %v505_v30, %v108_v31  ;;  %v578_v34 = vpop.f32.mrb[1].mxu0 }
 0x100   :  { %v111_v35 = vpop.f32.mrb[2].mxu0 }
 0x101   :  { %v127_v36 = vadd.f32 %v506_v32, %v120_v33  ;;  %v121_v37 = vmul.f32 %v505_v30, %v111_v35  ;;  %v579_v38 = vpop.f32.mrb[3].mxu0 }
 0x103   :  { %v128_v39 = vadd.f32 %v506_v32, %v121_v37  ;;  %v129_v40 = vmax.f32 %v127_v36, 0.0 }
 0x105   :  { %v130_v41 = vmax.f32 %v128_v39, 0.0 }
 0x107   :  { %v131_v42 = vpack.c.bf16 %v130_v41, %v129_v40 }
 0x109   :  { %261 = vmatmul.mubr.bf16.vlgmr.msra.gmra.mrb[0].mxu1 %v131_v42 }
 0x1dc   :  { %v262_v58 = vpop.f32.mrb[0].mxu1 }
 0x1dd   :  { %v283_v60 = vmul.f32 %v276_v55, %v262_v58  ;;  %v264_v61 = vpop.f32.mrb[1].mxu1 }
 0x1de   :  { %v284_v62 = vmul.f32 %v280_v56, %v264_v61  ;;  %v266_v63 = vpop.f32.mrb[2].mxu1 }
 0x1df   :  { %v300_v0 = vadd.f32 %v293_v57, %v283_v60  ;;  %v285_v1 = vmul.f32 %v276_v55, %v266_v63  ;;  %v268_v2 = vpop.f32.mrb[3].mxu1 }
 0x1e0   :  { %v301_v3 = vadd.f32 %v297_v59, %v284_v62  ;;  %v286_v4 = vmul.f32 %v280_v56, %v268_v2 }
 0x1e1   :  { %v302_v5 = vadd.f32 %v293_v57, %v285_v1  ;;  %v304_v7 = vmax.f32 %v300_v0, 0.0 }
 0x1e2   :  { %v303_v6 = vadd.f32 %v297_v59, %v286_v4  ;;  %v305_v9 = vmax.f32 %v301_v3, 0.0 }
 0x1e3   :  { %v306_v8 = vmax.f32 %v302_v5, 0.0 }
 0x1e4   :  { %v307_v10 = vmax.f32 %v303_v6, 0.0 }
 0x1e5   :  { %v308_v11 = vpack.c.bf16 %v306_v8, %v304_v7 }
 0x1e6   :  { %v309_v12 = vpack.c.bf16 %v307_v10, %v305_v9 }
 0x1e8   :  { %477 = vmatprep.mubr.bf16.mxu0 %v309_v12 }
 0x1e9   :  { %478 = vmatmul.mubr.bf16.vlgmr.msra.gmra.mrb[4].mxu0 %v308_v11 }
 0x2bc   :  { %v568_v13 = vpop.f32.mrb[4].mxu0 }
 0x2bd   :  { %v569_v14 = vpop.f32.mrb[5].mxu0 }
 0x2be   :  { %v570_v15 = vadd.f32 %v569_v14, %v568_v13  ;;  %v571_v16 = vpop.f32.mrb[6].mxu0 }
 0x2bf   :  { %v572_v18 = vpop.f32.mrb[7].mxu0 }
 0x2c0   :  { %v573_v19 = vadd.f32 %v572_v18, %v571_v16  ;;  %v480_v20 = vadd.f32 %v570_v15, %v524_v17 }
 0x2c2   :  { %v483_v21 = vadd.f32 %v573_v19, %v524_v17 }
 0x2c4   :  { %v548_v22 = vpack.c.bf16 %v483_v21, %v480_v20 }
 0x2c6   :  { %549 = vst [vmem:[%s783_s7] sm:$0xff] %v548_v22  }
 0x2c7   :  { %500 = vsyncpa [#allocation3], 1 }
 0x2c8   :  { %501 = vsyncpa [#allocation5], 1 }

</bundles_post_ra>
